<compile_context>
chip_gen: v7x
topology: tpu7x:2x2x1
jax: 0.10.0
libtpu: 0.0.40
codegen_flags: <defaults>
</compile_context>

<pallas_src>
import jax
import jax.numpy as jnp
from jax.experimental import pallas as pl
from jax.experimental.pallas import tpu as pltpu


_LANE = 128
# Candidate lane-dense slab widths (multiples of 128).
_WIDTHS = (16384, 8192, 4096, 2048, 1024, 512, 256, 128)
# Sublane packing per element size (rows per vreg).
_SUBLANE_PACK = {4: 8, 2: 16, 1: 32}


def _block_bytes_and_vmem_limit():
    """Generation-aware per-block byte budget and optional vmem_limit_bytes.

    VMEM footprint is 2 buffers x (input + output) = 4x the block bytes.
    """
    kind = ""
    try:
        kind = jax.devices()[0].device_kind.lower()
    except Exception:
        pass
    if "v7" in kind:
        # ~3.2 TB/s HBM: 8 MiB blocks keep per-step overhead ~5-8%.
        # 4 x 8 MiB = 32 MiB footprint hits the default scoped VMEM, so raise
        # the limit (well under the 64 MiB physical VMEM per TC).
        return 8 << 20, 40 << 20
    if "v6" in kind:
        # 4 MiB blocks -> 16 MiB footprint, under v6e's 32 MiB default scoped VMEM.
        return 4 << 20, None
    # v5e / unknown: 2 MiB blocks -> 8 MiB footprint, under the 16 MiB default.
    return 2 << 20, None


def _squared_relu_kernel(x_ref, o_ref):
    x = x_ref[...]
    if jnp.issubdtype(x_ref.dtype, jnp.floating) and x_ref.dtype.itemsize < 4:
        # Free (HBM-bound kernel): avoids fp16 overflow (|x| >~ 256 -> inf)
        # and bf16 rounding of the square.
        x = x.astype(jnp.float32)
    r = jnp.maximum(x, 0)       # relu; scalar 0 avoids a zeros tile
    o_ref[...] = (r * r).astype(o_ref.dtype)


def _pick_width(total, itemsize):
    sub = _SUBLANE_PACK.get(itemsize, 8)
    # Prefer the widest slab whose row count is a multiple of the sublane
    # packing (no padded vregs); fall back to the widest plain divisor.
    for w in _WIDTHS:
        if total % w == 0 and (total // w) % sub == 0:
            return w
    return next(w for w in _WIDTHS if total % w == 0)


def _squared_relu_2d(x2d):
    rows, width = x2d.shape
    itemsize = jnp.dtype(x2d.dtype).itemsize
    block_bytes, vmem_limit = _block_bytes_and_vmem_limit()

    target_rows = max(1, block_bytes // (width * itemsize))
    if target_rows >= rows:
        tr = rows                                  # full-extent block, single step
    else:
        tr = max(32, (target_rows // 32) * 32)     # 32 sublanes: valid for 32/16/8-bit
    grid = (pl.cdiv(rows, tr),)                    # partial last block is bounds-masked

    cp_kwargs = dict(dimension_semantics=("parallel",))
    if vmem_limit is not None:
        cp_kwargs["vmem_limit_bytes"] = vmem_limit
    # TODO(synk): on v7x, verify in a trace that both TensorCores pick up the
    # grid; if not, a leading CORE_PARALLEL axis over row halves would help.

    return pl.pallas_call(
        _squared_relu_kernel,
        out_shape=jax.ShapeDtypeStruct((rows, width), x2d.dtype),
        grid_spec=pltpu.PrefetchScalarGridSpec(
            num_scalar_prefetch=0,
            grid=grid,
            in_specs=[pl.BlockSpec((tr, width), lambda i: (i, 0))],
            out_specs=pl.BlockSpec((tr, width), lambda i: (i, 0)),
        ),
        compiler_params=pltpu.CompilerParams(**cp_kwargs),
    )(x2d)


def _squared_relu_jnp(x):
    xf = x
    if jnp.issubdtype(x.dtype, jnp.floating) and jnp.dtype(x.dtype).itemsize < 4:
        xf = x.astype(jnp.float32)
    r = jnp.maximum(xf, 0)
    return (r * r).astype(x.dtype)


def squared_relu(x):
    """Elementwise squared ReLU: relu(x) ** 2. Accepts any shape / float dtype."""
    # TODO(synk): in a full model, fuse r*r into the producer kernel's epilogue
    # (or the consumer's load) instead of paying a standalone HBM round trip.
    orig_shape = x.shape
    total = x.size
    if total == 0:
        return x

    itemsize = jnp.dtype(x.dtype).itemsize
    x_flat = x.reshape(-1)
    rem = total % _LANE

    if rem == 0:
        # Hot path: free contiguous reshape to a lane-dense slab, no padding.
        width = _pick_width(total, itemsize)
        out2d = _squared_relu_2d(x_flat.reshape(total // width, width))
        return out2d.reshape(orig_shape)

    # Ragged tail: Pallas kernel on the 128-aligned prefix, plain jnp on the
    # (<128-element) tail. Avoids pad/concatenate + output-slice round trips.
    prefix = total - rem
    if prefix == 0:
        return _squared_relu_jnp(x)
    width = _pick_width(prefix, itemsize)
    head = _squared_relu_2d(x_flat[:prefix].reshape(prefix // width, width))
    tail = _squared_relu_jnp(x_flat[prefix:])
    return jnp.concatenate([head.reshape(-1), tail]).reshape(orig_shape)


if __name__ == "__main__":
    key = jax.random.PRNGKey(0)
    # Small NCHW input consistent with a conv-style activation usage.
    x = jax.random.normal(key, (2, 4, 16, 16), dtype=jnp.float32)

    y = jax.block_until_ready(squared_relu(x))
    y_ref = jnp.square(jnp.maximum(x, 0.0))
    assert y.shape == x.shape and y.dtype == x.dtype
    assert jnp.allclose(y, y_ref, atol=1e-6, rtol=1e-6)

    # bf16 path: in-kernel f32 compute, cast back on the store.
    xb = x.astype(jnp.bfloat16)
    yb = jax.block_until_ready(squared_relu(xb))
    yb_ref = jnp.square(jnp.maximum(xb.astype(jnp.float32), 0.0)).astype(jnp.bfloat16)
    assert yb.dtype == jnp.bfloat16
    assert jnp.allclose(yb.astype(jnp.float32), yb_ref.astype(jnp.float32),
                        atol=1e-2, rtol=1e-2)

    # Ragged-tail path: 128-aligned prefix through the kernel + jnp tail.
    xr = jax.random.normal(jax.random.PRNGKey(1), (3, 50), dtype=jnp.float32)
    yr = jax.block_until_ready(squared_relu(xr))
    assert jnp.allclose(yr, jnp.square(jnp.maximum(xr, 0.0)), atol=1e-6, rtol=1e-6)

    print("KERNEL_OK")
</pallas_src>

<mosaic_0001>
module attributes {stable_mosaic.version = 11 : i64} {
  func.func @_squared_relu_kernel(%arg0: i32, %arg1: memref<8x256xf32, #tpu.memory_space<vmem>>, %arg2: memref<8x256xf32, #tpu.memory_space<vmem>>) attributes {dimension_semantics = [#tpu.dimension_semantics<parallel>], iteration_bounds = array<i64: 1>, scalar_prefetch = 0 : i64, scratch_operands = 0 : i64, tpu.core_type = #tpu.core_type<tc>, window_params = [{transform_indices = @transform_0, window_bounds = array<i64: 8, 256>}, {transform_indices = @transform_1, window_bounds = array<i64: 8, 256>}]} {
    %c0 = arith.constant 0 : index
    %c0_0 = arith.constant 0 : index
    %0 = vector.load %arg1[%c0, %c0_0] : memref<8x256xf32, #tpu.memory_space<vmem>>, vector<8x256xf32>
    %cst = arith.constant 0.000000e+00 : f32
    %1 = vector.broadcast %cst : f32 to vector<8x256xf32>
    %2 = arith.maximumf %0, %1 : vector<8x256xf32>
    %3 = arith.mulf %2, %2 : vector<8x256xf32>
    %c0_1 = arith.constant 0 : index
    %c0_2 = arith.constant 0 : index
    %4 = vector.load %arg2[%c0_1, %c0_2] : memref<8x256xf32, #tpu.memory_space<vmem>>, vector<8x256xf32>
    tpu.vector_store %arg2[%c0_1, %c0_2], %3 {strides = array<i32>} : memref<8x256xf32, #tpu.memory_space<vmem>>, vector<8x256xf32>,
    return
  }
  func.func @transform_0(%arg0: i32) -> (i32, i32) {
    %c0_i32 = arith.constant 0 : i32
    %c0_i32_0 = arith.constant 0 : i32
    return %arg0, %c0_i32 : i32, i32
  }
  func.func @transform_1(%arg0: i32) -> (i32, i32) {
    %c0_i32 = arith.constant 0 : i32
    %c0_i32_0 = arith.constant 0 : i32
    return %arg0, %c0_i32 : i32, i32
  }
}

</mosaic_0001>

<bundles_post_ra>
// kernel: tpu_custom_call.1
= control target key start
LH: loop header
LB: loop body
LE: loop exit
PB: predicated region body
PF: predicated region fallthrough
CT: control target
= control target key end

     0   :  { %6 = vsyncpa [#allocation3], 0  ;;  %s130_s0 = inlined_call_operand.hbm [shape: f32[8,256], index: 0, kind: input, shape index: {}]   ;;  %s131_s1 = inlined_call_operand.hbm [shape: f32[8,256], index: 1, kind: output, shape index: {}]  }
   0x1   :  { %7 = vsyncpa [#allocation4], 0  ;;  %s94_s6 = smov [#allocation2]   ;;  %s46_s10 = scalar_lea.hbm %s130_s0, 256 }
   0x2   :  { %s14_s7 = sshll.u32 %s94_s6, 4  ;;  %p47_p0 = scmp.ne.s32.totalorder %s130_s0, %s46_s10  ;;  %s15_s7 = int_to_ptr.vmem [resolvable:$true] %s14_s7 }
   0x3   :  { %p50_p1 = scmp.lt.u32.totalorder %s46_s10, %s130_s0 }
   0x5   :  { %p52_p2 = pnand %p50_p1, %p47_p0 }
   0x7   :  { %55 = shalt.err (!%p52_p2)
}
   0x8   :  { %s56_s15 = scalar_lea.vmem %s15_s7, 256  ;;  %p61_p4 = scmp.lt.s32.totalorder %s15_s7, %s15_s7 }
   0x9   :  { %p57_p3 = scmp.ne.s32.totalorder %s15_s7, %s56_s15  ;;  %p62_p5 = scmp.lt.s32.totalorder %s56_s15, %s56_s15 }
   0xb   :  { %p63_p6 = por %p62_p5, %p61_p4 }
   0xd   :  { %p64_p7 = pnand %p63_p6, %p57_p3 }
   0xf   :  { %67 = shalt.err (!%p64_p7)
}
  0x10   :  { %17 = dma.hbm_to_vmem [thread:$0]  %s130_s0, 256, %s15_s7, [#allocation3]  }
  0x11   :  { %90 = dma.done.wait [#allocation3], 256  }
  0x12   :  { %91 = vsyncadd [#allocation3], 4294967040  ;;  %v21_v0 = vld [vmem:[#allocation2] sm:$0xff]  ;;  %v22_v1 = vld [vmem:[#allocation2 + $0x8] sm:$0xff]  ;;  %s95_s18 = smov [#allocation5]  }
  0x13   :  { %s35_s19 = sshll.u32 %s95_s18, 4  ;;  %v23_v2 = vmax.f32 %v21_v0, 0.0  ;;  %v24_v3 = vmax.f32 %v22_v1, 0.0  ;;  %s36_s19 = int_to_ptr.vmem [resolvable:$true] %s35_s19 }
  0x14   :  { %s68_s20 = scalar_lea.vmem %s36_s19, 256  ;;  %p73_p9 = scmp.lt.s32.totalorder %s36_s19, %s36_s19 }
  0x15   :  { %v25_v4 = vmul.f32 %v23_v2, %v23_v2  ;;  %v26_v5 = vmul.f32 %v24_v3, %v24_v3  ;;  %p69_p8 = scmp.ne.s32.totalorder %s36_s19, %s68_s20  ;;  %p74_p10 = scmp.lt.s32.totalorder %s68_s20, %s68_s20 }
  0x17   :  { %27 = vst [vmem:[#allocation5] sm:$0xff] %v25_v4  ;;  %28 = vst [vmem:[#allocation5 + $0x8] sm:$0xff] %v26_v5  ;;  %p75_p11 = por %p74_p10, %p73_p9 }
  0x19   :  { %p76_p12 = pnand %p75_p11, %p69_p8 }
  0x1b   :  { %79 = shalt.err (!%p76_p12)
}
  0x1c   :  { %s80_s22 = scalar_lea.hbm %s131_s1, 256 }
  0x1d   :  { %p81_p13 = scmp.ne.s32.totalorder %s131_s1, %s80_s22  ;;  %p84_p0 = scmp.lt.u32.totalorder %s80_s22, %s131_s1 }
  0x1f   :  { %p86_p1 = pnand %p84_p0, %p81_p13 }
  0x21   :  { %89 = shalt.err (!%p86_p1)
}
  0x22   :  { %38 = dma.vmem_to_hbm [thread:$0]  %s36_s19, 256, %s131_s1, [#allocation4]  }
  0x23   :  { %92 = dma.done.wait [#allocation4], 256  }
  0x24   :  { %93 = vsyncadd [#allocation4], 4294967040 }
  0x25   :  { %42 = vsyncpa [#allocation3], 1 }
  0x26   :  { %43 = vsyncpa [#allocation4], 1 }

</bundles_post_ra>
